<compile_context>
chip_gen: v5e
topology: v5e:2x2
jax: 0.10.0
libtpu: 0.0.40
codegen_flags: <defaults>
</compile_context>

<pallas_src>
import jax
import jax.numpy as jnp
from jax import lax
from jax.experimental import pallas as pl
from jax.experimental.pallas import tpu as pltpu


# ----------------------------------------------------------------------------
# Faithful stub of the reference module's forward (it is literally `pass`).
# ----------------------------------------------------------------------------
def convirt_forward_faithful():
    return None


# ----------------------------------------------------------------------------
# Helpers
# ----------------------------------------------------------------------------
def _round_up(x, m):
    return ((x + m - 1) // m) * m


def _largest_divisor(n, cap):
    cap = max(1, min(n, int(cap)))
    for t in range(cap, 0, -1):
        if n % t == 0:
            return t
    return 1


# ----------------------------------------------------------------------------
# Kernel factory: streamed global-average-pool + linear classifier.
#   grid = (cdiv(B, TB), cdiv(S, TS));
#   axis 0 = batch ("parallel"), axis 1 = spatial reduction ("arbitrary", last).
# ----------------------------------------------------------------------------
def _make_gap_linear_kernel(ts, s_total, need_mask):
    def kernel(x_ref, w_ref, b_ref, o_ref, acc_ref):
        # x_ref:   [TB, C, TS]  activations in native NCHW ([B,C,S]) layout,
        #                       spatial on lanes, streamed from HBM as-is.
        # w_ref:   [C, NP]      f32 classifier weights (1/S pre-folded).
        # b_ref:   [1, NP]      f32 bias row (lane-dense padded).
        # o_ref:   [TB, NP]     f32 logits, resident across the spatial axis.
        # acc_ref: [TB, C]      f32 scratch accumulator of spatial sums.
        si = pl.program_id(1)

        @pl.when(si == 0)
        def _init():
            acc_ref[...] = jnp.zeros_like(acc_ref)

        x = x_ref[...]
        if need_mask:
            # Only generated when S is not a multiple of TS: zero out the
            # out-of-range spatial lanes of the last (partial) block.
            lane = lax.broadcasted_iota(jnp.int32, x.shape, 2)
            x = jnp.where(si * ts + lane < s_total, x, jnp.zeros_like(x))

        # Partial spatial sum (native f32 stream, no upcast temporary).
        acc_ref[...] += jnp.sum(x.astype(jnp.float32), axis=-1)

        @pl.when(si == pl.num_programs(1) - 1)
        def _finalize():
            # Tiny classifier matmul on the MXU; 1/(H*W) already folded into w.
            logits = jnp.dot(acc_ref[...], w_ref[...],
                             preferred_element_type=jnp.float32)
            o_ref[...] = logits + b_ref[...]

    return kernel


def convirt_classify(x_nchw, w, b, *, max_block_bytes=2 * 1024 * 1024,
                     max_batch_tile=64):
    """x_nchw: [B, C, H, W]; w: [C, NUM_CLASSES]; b: [NUM_CLASSES] -> [B, NUM_CLASSES]."""
    B, C, H, W = x_nchw.shape
    S = H * W
    num_classes = w.shape[1]
    NP = _round_up(num_classes, 128)          # lane-dense padded class dim

    # Free, contiguous view (no host-side data movement).
    x_bcs = x_nchw.reshape(B, C, S)
    itemsize = jnp.dtype(x_bcs.dtype).itemsize

    # Fold the 1/(H*W) mean scaling into the (tiny) weight matrix; pad weights
    # and bias to the lane-dense class dimension.
    w_pad = jnp.zeros((C, NP), jnp.float32).at[:, :num_classes].set(
        w.astype(jnp.float32) / float(S))
    b_pad = jnp.zeros((1, NP), jnp.float32).at[:, :num_classes].set(
        b.astype(jnp.float32).reshape(1, num_classes))

    # ---- tile sizing (capped block bytes; NOT derived from physical VMEM) ---
    ts_unit = min(S, 128)
    row_cap = max(1, max_block_bytes // max(C * ts_unit * itemsize, 1))
    if B >= 16:
        # Multiple-of-8 batch tile with >= 2 "parallel" iterations (v7x megacore).
        tb = min(max_batch_tile, B // 2, row_cap)
        TB = max(8, (tb // 8) * 8)
    else:
        # Tiny batch: one full-batch block (compile-safe tiling).
        # TODO(synk): for tiny B on v7x, the spatial axis could be core-split
        #             with two partial accumulators combined in the finalize.
        TB = B

    if S <= 128:
        TS = S
        need_mask = False
    else:
        ts_budget = max(128, (max_block_bytes // max(TB * C * itemsize, 1))
                        // 128 * 128)
        ts_cap = min(ts_budget, (S // 128) * 128)
        TS = None
        for t in range(ts_cap, 127, -128):    # prefer a divisor of S
            if S % t == 0:
                TS = t
                break
        if TS is None:
            TS = ts_cap                        # tail block masked in-kernel
        need_mask = (S % TS) != 0

    grid = (pl.cdiv(B, TB), pl.cdiv(S, TS))

    # ---- explicit scoped-VMEM budget (double-buffered x + temps + residents) -
    x_block = TB * C * TS * itemsize
    w_bytes = C * NP * 4
    b_bytes = 8 * NP * 4
    o_block = max(TB, 8) * NP * 4
    acc_bytes = max(TB, 8) * max(C, 128) * 4
    vmem_limit = (3 * x_block                       # 2 pipeline buffers + temp
                  + 2 * (w_bytes + b_bytes + o_block)
                  + acc_bytes + (2 << 20))          # slack
    vmem_limit = int(min(max(vmem_limit, 8 << 20), 64 << 20))

    kernel = _make_gap_linear_kernel(TS, S, need_mask)

    out_padded = pl.pallas_call(
        kernel,
        out_shape=jax.ShapeDtypeStruct((B, NP), jnp.float32),
        grid_spec=pltpu.PrefetchScalarGridSpec(
            num_scalar_prefetch=0,
            grid=grid,
            in_specs=[
                pl.BlockSpec((TB, C, TS), lambda bi, si: (bi, 0, si)),
                pl.BlockSpec((C, NP), lambda bi, si: (0, 0)),
                pl.BlockSpec((1, NP), lambda bi, si: (0, 0)),
            ],
            out_specs=pl.BlockSpec((TB, NP), lambda bi, si: (bi, 0)),
            scratch_shapes=[pltpu.VMEM((TB, C), jnp.float32)],
        ),
        compiler_params=pltpu.CompilerParams(
            dimension_semantics=("parallel", "arbitrary"),
            vmem_limit_bytes=vmem_limit),
    )(x_bcs, w_pad, b_pad)

    return out_padded[:, :num_classes]


if __name__ == "__main__":
    # Small deterministic shapes consistent with an image-classification head.
    B, C, H, W = 2, 4, 16, 16
    NUM_CLASSES = 8

    key = jax.random.PRNGKey(0)
    kx, kw, kb = jax.random.split(key, 3)
    x = jax.random.normal(kx, (B, C, H, W), dtype=jnp.float32)
    w = jax.random.normal(kw, (C, NUM_CLASSES), dtype=jnp.float32) * 0.02
    b = jax.random.normal(kb, (NUM_CLASSES,), dtype=jnp.float32) * 0.02

    # Faithful reference forward is a no-op (returns None).
    assert convirt_forward_faithful() is None

    # Run the Pallas kernel for the representative classification head.
    logits = convirt_classify(x, w, b)
    jax.block_until_ready(logits)

    # Cross-check against a plain-JAX f32 reference (kernel now streams f32,
    # so no bf16 quantization is involved).
    ref = x.reshape(B, C, H * W).mean(axis=-1) @ w + b
    assert jnp.allclose(logits, ref, atol=1e-4, rtol=1e-4)

    print("KERNEL_OK")
</pallas_src>

<mosaic_0001>
module attributes {stable_mosaic.version = 11 : i64} {
  func.func @kernel(%arg0: i32, %arg1: i32, %arg2: memref<2x4x256xf32, #tpu.memory_space<vmem>>, %arg3: memref<4x128xf32, #tpu.memory_space<vmem>>, %arg4: memref<1x128xf32, #tpu.memory_space<vmem>>, %arg5: memref<2x128xf32, #tpu.memory_space<vmem>>, %arg6: memref<2x4xf32, #tpu.memory_space<vmem>>) attributes {dimension_semantics = [#tpu.dimension_semantics<parallel>, #tpu.dimension_semantics<arbitrary>], iteration_bounds = array<i64: 1, 1>, scalar_prefetch = 0 : i64, scratch_operands = 1 : i64, tpu.core_type = #tpu.core_type<tc>, window_params = [{transform_indices = @transform_0, window_bounds = array<i64: 2, 4, 256>}, {pipeline_mode = #tpu.pipeline_mode<synchronous>, transform_indices = @transform_1, window_bounds = array<i64: 4, 128>}, {pipeline_mode = #tpu.pipeline_mode<synchronous>, transform_indices = @transform_2, window_bounds = array<i64: 1, 128>}, {transform_indices = @transform_3, window_bounds = array<i64: 2, 128>}]} {
    %c0_i32 = arith.constant 0 : i32
    %0 = arith.cmpi eq, %arg1, %c0_i32 : i32
    %1 = arith.extui %0 : i1 to i32
    %c0_i32_0 = arith.constant 0 : i32
    %2 = arith.cmpi ne, %1, %c0_i32_0 : i32
    scf.if %2 {
      %cst_9 = arith.constant 0.000000e+00 : f32
      %11 = vector.broadcast %cst_9 : f32 to vector<2x4xf32>
      %c0_10 = arith.constant 0 : index
      %c0_11 = arith.constant 0 : index
      %12 = vector.load %arg6[%c0_10, %c0_11] : memref<2x4xf32, #tpu.memory_space<vmem>>, vector<2x4xf32>
      tpu.vector_store %arg6[%c0_10, %c0_11], %11 {strides = array<i32>} : memref<2x4xf32, #tpu.memory_space<vmem>>, vector<2x4xf32>,
    } else {
    }
    %c0 = arith.constant 0 : index
    %c0_1 = arith.constant 0 : index
    %c0_2 = arith.constant 0 : index
    %3 = vector.load %arg2[%c0, %c0_1, %c0_2] : memref<2x4x256xf32, #tpu.memory_space<vmem>>, vector<2x4x256xf32>
    %c0_3 = arith.constant 0 : index
    %c0_4 = arith.constant 0 : index
    %4 = vector.load %arg6[%c0_3, %c0_4] : memref<2x4xf32, #tpu.memory_space<vmem>>, vector<2x4xf32>
    %cst = arith.constant dense<0.000000e+00> : vector<2x4xf32>
    %5 = vector.multi_reduction <add>, %3, %cst [2] : vector<2x4x256xf32> to vector<2x4xf32>
    %6 = arith.addf %4, %5 : vector<2x4xf32>
    %c0_5 = arith.constant 0 : index
    %c0_6 = arith.constant 0 : index
    %7 = vector.load %arg6[%c0_5, %c0_6] : memref<2x4xf32, #tpu.memory_space<vmem>>, vector<2x4xf32>
    tpu.vector_store %arg6[%c0_5, %c0_6], %6 {strides = array<i32>} : memref<2x4xf32, #tpu.memory_space<vmem>>, vector<2x4xf32>,
    %c0_i32_7 = arith.constant 0 : i32
    %8 = arith.cmpi eq, %arg1, %c0_i32_7 : i32
    %9 = arith.extui %8 : i1 to i32
    %c0_i32_8 = arith.constant 0 : i32
    %10 = arith.cmpi ne, %9, %c0_i32_8 : i32
    scf.if %10 {
      %c0_9 = arith.constant 0 : index
      %c0_10 = arith.constant 0 : index
      %11 = vector.load %arg6[%c0_9, %c0_10] : memref<2x4xf32, #tpu.memory_space<vmem>>, vector<2x4xf32>
      %c0_11 = arith.constant 0 : index
      %c0_12 = arith.constant 0 : index
      %12 = vector.load %arg3[%c0_11, %c0_12] : memref<4x128xf32, #tpu.memory_space<vmem>>, vector<4x128xf32>
      %cst_13 = arith.constant dense<0.000000e+00> : vector<2x128xf32>
      %13 = tpu.matmul %11, %12, %cst_13 {dimension_numbers = #tpu.dot_dimension_numbers<[1], [0], [0], [1], [0, 0, 1, 1], [], []>} : vector<2x4xf32>, vector<4x128xf32>, vector<2x128xf32> -> vector<2x128xf32>
      %c0_14 = arith.constant 0 : index
      %c0_15 = arith.constant 0 : index
      %14 = vector.load %arg4[%c0_14, %c0_15] : memref<1x128xf32, #tpu.memory_space<vmem>>, vector<1x128xf32>
      %15 = vector.broadcast %14 : vector<1x128xf32> to vector<2x128xf32>
      %16 = arith.addf %13, %15 : vector<2x128xf32>
      %c0_16 = arith.constant 0 : index
      %c0_17 = arith.constant 0 : index
      %17 = vector.load %arg5[%c0_16, %c0_17] : memref<2x128xf32, #tpu.memory_space<vmem>>, vector<2x128xf32>
      tpu.vector_store %arg5[%c0_16, %c0_17], %16 {strides = array<i32>} : memref<2x128xf32, #tpu.memory_space<vmem>>, vector<2x128xf32>,
    } else {
    }
    return
  }
  func.func @transform_0(%arg0: i32, %arg1: i32) -> (i32, i32, i32) {
    %c0_i32 = arith.constant 0 : i32
    %c0_i32_0 = arith.constant 0 : i32
    return %arg0, %c0_i32, %arg1 : i32, i32, i32
  }
  func.func @transform_1(%arg0: i32, %arg1: i32) -> (i32, i32) {
    %c0_i32 = arith.constant 0 : i32
    %c0_i32_0 = arith.constant 0 : i32
    %c0_i32_1 = arith.constant 0 : i32
    return %c0_i32, %c0_i32_0 : i32, i32
  }
  func.func @transform_2(%arg0: i32, %arg1: i32) -> (i32, i32) {
    %c0_i32 = arith.constant 0 : i32
    %c0_i32_0 = arith.constant 0 : i32
    %c0_i32_1 = arith.constant 0 : i32
    return %c0_i32, %c0_i32_0 : i32, i32
  }
  func.func @transform_3(%arg0: i32, %arg1: i32) -> (i32, i32) {
    %c0_i32 = arith.constant 0 : i32
    %c0_i32_0 = arith.constant 0 : i32
    return %arg0, %c0_i32 : i32, i32
  }
}

</mosaic_0001>

<bundles_post_ra>
// kernel: tpu_custom_call.1
= control target key start
LH: loop header
LB: loop body
LE: loop exit
PB: predicated region body
PF: predicated region fallthrough
CT: control target
= control target key end

     0   :  { %8 = vsyncpa [#allocation4], 0  ;;  %s275_s0 = inlined_call_operand.hbm [shape: f32[2,4,256], index: 0, kind: input, shape index: {}]   ;;  %s276_s1 = inlined_call_operand.hbm [shape: f32[4,128], index: 1, kind: input, shape index: {}]   ;;  %s277_s2 = inlined_call_operand.vmem [shape: f32[1,128], index: 2, kind: input, shape index: {}]   ;;  %s278_s3 = inlined_call_operand.hbm [shape: f32[2,128], index: 3, kind: output, shape index: {}]  }
   0x1   :  { %9 = vsyncpa [#allocation7], 0 }
   0x2   :  { %10 = vsyncpa [#allocation5], 0  ;;  %s15_s14 = sshll.u32 %s275_s0, 4  ;;  %s232_s15 = smov [#allocation3]   ;;  %s16_s14 = int_to_ptr.hbm [resolvable:$true] %s15_s14 }
   0x3   :  { %s17_s16 = sshll.u32 %s232_s15, 4  ;;  %s29_s19 = sshll.u32 %s276_s1, 4  ;;  %s18_s16 = int_to_ptr.vmem [resolvable:$true] %s17_s16  ;;  %s30_s19 = int_to_ptr.hbm [resolvable:$true] %s29_s19 }
   0x4   :  { %s233_s20 = smov 128   ;;  %s234_s21 = smov 8  }
   0x5   :  { %23 = dma.hbm_to_vmem [thread:$0]  %s16_s14, 256, %s18_s16, [#allocation4], %s233_s20, %s233_s20, %s234_s21  }
   0x6   :  { %s235_s22 = smov [#allocation6]  }
   0x7   :  { %s31_s23 = sshll.u32 %s235_s22, 4  ;;  %s32_s23 = int_to_ptr.vmem [resolvable:$true] %s31_s23 }
   0x8   :  { %34 = dma.hbm_to_vmem [thread:$0]  %s30_s19, 64, %s32_s23, [#allocation7]  }
   0x9   :  { %226 = dma.done.wait [#allocation4], 256  }
   0xa   :  { %227 = vsyncadd [#allocation4], 4294967040 }
   0xb   :  { %228 = dma.done.wait [#allocation7], 64  }
   0xc   :  { %229 = vsyncadd [#allocation7], 4294967232  ;;  %v51_v0 = vld [vmem:[#allocation3] sm:$0xff]  ;;  %v52_v1 = vld [vmem:[#allocation3 + $0x8] sm:$0xff]  ;;  %vm67_vm0 = vcmask 1043456   ;;  %vm49_vm1 = vcmask 25600   ;;  %v80_v15 = vlaneseq }
   0xd   :  { %56 = vst [vmem:[#allocation1] ss:$2 sm:$0xff] %v51_v0  ;;  %v236_v12 = vmov 0.0   ;;  %v94_v13 = vld [vmem:[#allocation6] sm:$0xf]  ;;  %vm84_vm2 = vcmask 1041409  }
   0xe   :  { %60 = vst [vmem:[#allocation1 + $0x10] ss:$2 sm:$0xff] %v52_v1  ;;  %145 = vmatpush.msk.msra.mxu0 %vm67_vm0, %v94_v13  ;;  %v81_v16 = vand.u32 127, %v80_v15  ;;  %vm99_vm3 = vcmask 31744   ;;  %v153_v24 = vld [vmem:[%s277_s2] ss:$0 sm:$0xff] }
   0xf   :  { %50 = vst.msk [vmem:[#allocation2] sm:$0x3] %vm49_vm1, %v236_v12  ;;  %s237_s24 = smov [#allocation8]   ;;  %s134_s28 = sshll.u32 %s278_s3, 4  ;;  %s135_s28 = int_to_ptr.hbm [resolvable:$true] %s134_s28 }
  0x10   :  { %s132_s25 = sshll.u32 %s237_s24, 4  ;;  %s133_s25 = int_to_ptr.vmem [resolvable:$true] %s132_s25 }
  0x14   :  { %v57_v2 = vld.sshfl [vmem:[#allocation1] sm:$0xff pattern:$0x75316420]  ;;  %v58_v3 = vld.sshfl [vmem:[#allocation1 + $0x8] sm:$0xff pattern:$0x75316420] }
  0x15   :  { %v68_v4 = vsel %vm67_vm0, %v57_v2, 0.0  ;;  %v69_v5 = vsel %vm67_vm0, %v58_v3, 0.0  ;;  %v61_v7 = vld.sshfl [vmem:[#allocation1 + $0x10] sm:$0xff pattern:$0x75316420] }
  0x16   :  { %v70_v6 = vadd.f32 %v69_v5, %v68_v4  ;;  %v62_v8 = vld.sshfl [vmem:[#allocation1 + $0x18] sm:$0xff pattern:$0x75316420]  ;;  %v73_v9 = vsel %vm67_vm0, %v61_v7, 0.0  ;;  %v53_v19 = vld [vmem:[#allocation2] sm:$0x3] }
  0x17   :  { %v74_v10 = vsel %vm67_vm0, %v62_v8, 0.0 }
  0x18   :  { %71 = vadd.xlane.f32.xlu0 %v70_v6  ;;  %v75_v11 = vadd.f32 %v74_v10, %v73_v9 }
  0x20   :  { %76 = vadd.xlane.f32.xlu0 %v75_v11 }
  0x8b   :  { %v72_v14 = vpop.xlane.xlu0 %71 }
  0x8c   :  { %v82_v18 = vperm.slane %v72_v14, %v81_v16 }
  0x93   :  { %v77_v17 = vpop.xlane.xlu0 %76 }
  0x94   :  { %v83_v20 = vperm.slane %v77_v17, %v81_v16 }
  0x96   :  { %v85_v21 = vsel %vm84_vm2, %v83_v20, %v82_v18 }
  0x97   :  { %v87_v22 = vadd.f32 %v85_v21, %v53_v19 }
  0x99   :  { %89 = vst.msk [vmem:[#allocation2] sm:$0x3] %vm49_vm1, %v87_v22 }
  0xa0   :  { %v93_v23 = vld [vmem:[#allocation2] sm:$0x3] }
  0xa1   :  { %146 = vmatmul.msk.f32.vlgmr.msra.gmra.mxu0 %vm99_vm3, %v93_v23 }
 0x11e   :  { %v123_v25 = vpop.f32.mrf.mxu0 }
 0x11f   :  { %v124_v26 = vadd.f32 %v153_v24, %v123_v25 }
 0x121   :  { %126 = vst [vmem:[#allocation8] sm:$0x3] %v124_v26 }
 0x122   :  { %137 = dma.vmem_to_hbm [thread:$0]  %s133_s25, 32, %s135_s28, [#allocation5]  }
 0x123   :  { %230 = dma.done.wait [#allocation5], 32  }
 0x124   :  { %231 = vsyncadd [#allocation5], 4294967264 }
 0x125   :  { %142 = vsyncpa [#allocation4], 1 }
 0x126   :  { %143 = vsyncpa [#allocation7], 1 }
 0x127   :  { %144 = vsyncpa [#allocation5], 1 }

</bundles_post_ra>
